<compile_context>
chip_gen: v7x
topology: tpu7x:2x2x1
jax: 0.10.0
libtpu: 0.0.40
codegen_flags: <defaults>
</compile_context>

<pallas_src>
import jax
import jax.numpy as jnp
from jax.experimental import pallas as pl
from jax.experimental.pallas import tpu as pltpu

LANE = 128


def _round_up(n, m):
    return ((n + m - 1) // m) * m


def _spectral_mix_kernel(xr_ref, xi_ref, wr_ref, wi_ref, or_ref, oi_ref):
    """Complex channel mixing over the flattened retained modes (one batch element).

    Shapes (per grid step):
      xr/xi : (1, Cin, K)    real / imag of the retained x_ft modes (lane-dense K)
      wr/wi : (Cin, Cout, K) real / imag of stacked [weights1 | weights2]
      or/oi : (1, Cout, K)   real / imag of the mixed modes
    """
    cin, cout, k = wr_ref.shape
    acc_r = jnp.zeros((cout, k), jnp.float32)
    acc_i = jnp.zeros((cout, k), jnp.float32)
    # Unrolled contraction over the small input-channel axis: pure VPU work, broadcast
    # of the (1, K) activation row over the Cout sublanes of the weight tile.
    for i in range(cin):
        xr_i = xr_ref[0, i:i + 1, :]      # (1, K)
        xi_i = xi_ref[0, i:i + 1, :]
        wr_i = wr_ref[i, :, :]            # (Cout, K)
        wi_i = wi_ref[i, :, :]
        acc_r = acc_r + xr_i * wr_i - xi_i * wi_i
        acc_i = acc_i + xr_i * wi_i + xi_i * wr_i
    or_ref[0, :, :] = acc_r
    oi_ref[0, :, :] = acc_i


def spectral_conv2d(x, w1r, w1i, w2r, w2i, modes1, modes2):
    """SpectralConv2d forward pass.

    Args:
      x:          (B, Cin, H, W) float32
      w1r, w1i:   (Cin, Cout, modes1, modes2) float32 (real / imag of weights1)
      w2r, w2i:   (Cin, Cout, modes1, modes2) float32 (real / imag of weights2)
    Returns:
      (B, Cout, H, W) float32
    """
    b, cin, h, w = x.shape
    cout = w1r.shape[1]
    wf = w // 2 + 1
    k = 2 * modes1 * modes2
    k_pad = _round_up(k, LANE)

    # Forward FFT (XLA op; no Pallas FFT primitive).
    x_ft = jnp.fft.rfft2(x)                                   # (B, Cin, H, Wf) complex64

    # Gather + stack the two retained mode blocks, flatten modes to a lane-dense axis.
    lo = x_ft[:, :, :modes1, :modes2]
    hi = x_ft[:, :, h - modes1:, :modes2]
    blk = jnp.concatenate([lo, hi], axis=2)                   # (B, Cin, 2*m1, m2)
    xr = jnp.real(blk).reshape(b, cin, k).astype(jnp.float32)
    xi = jnp.imag(blk).reshape(b, cin, k).astype(jnp.float32)

    wr = jnp.concatenate([w1r, w2r], axis=2).reshape(cin, cout, k)
    wi = jnp.concatenate([w1i, w2i], axis=2).reshape(cin, cout, k)

    pad = k_pad - k
    if pad:
        pad3 = ((0, 0), (0, 0), (0, pad))
        xr, xi = jnp.pad(xr, pad3), jnp.pad(xi, pad3)
        wr, wi = jnp.pad(wr, pad3), jnp.pad(wi, pad3)

    out_r, out_i = pl.pallas_call(
        _spectral_mix_kernel,
        out_shape=(
            jax.ShapeDtypeStruct((b, cout, k_pad), jnp.float32),
            jax.ShapeDtypeStruct((b, cout, k_pad), jnp.float32),
        ),
        grid=(b,),
        in_specs=[
            pl.BlockSpec((1, cin, k_pad), lambda i: (i, 0, 0)),
            pl.BlockSpec((1, cin, k_pad), lambda i: (i, 0, 0)),
            pl.BlockSpec((cin, cout, k_pad), lambda i: (0, 0, 0)),
            pl.BlockSpec((cin, cout, k_pad), lambda i: (0, 0, 0)),
        ],
        out_specs=(
            pl.BlockSpec((1, cout, k_pad), lambda i: (i, 0, 0)),
            pl.BlockSpec((1, cout, k_pad), lambda i: (i, 0, 0)),
        ),
        compiler_params=pltpu.CompilerParams(dimension_semantics=("parallel",)),
    )(xr, xi, wr, wi)

    # Unpad, reassemble complex modes, scatter into the zero spectrum, inverse FFT.
    out = (out_r[:, :, :k] + 1j * out_i[:, :, :k]).reshape(b, cout, 2 * modes1, modes2)
    out_lo = out[:, :, :modes1, :]
    out_hi = out[:, :, modes1:, :]

    out_ft = jnp.zeros((b, cout, h, wf), dtype=jnp.complex64)
    out_ft = out_ft.at[:, :, :modes1, :modes2].set(out_lo)
    out_ft = out_ft.at[:, :, h - modes1:, :modes2].set(out_hi)
    return jnp.fft.irfft2(out_ft, s=(h, w))


def spectral_conv2d_ref(x, weights1, weights2, modes1, modes2):
    """Plain-JAX reference with identical semantics (for sanity checking)."""
    b, cin, h, w = x.shape
    cout = weights1.shape[1]
    x_ft = jnp.fft.rfft2(x)
    out_ft = jnp.zeros((b, cout, h, w // 2 + 1), dtype=jnp.complex64)
    out_ft = out_ft.at[:, :, :modes1, :modes2].set(
        jnp.einsum('bixy,ioxy->boxy', x_ft[:, :, :modes1, :modes2], weights1))
    out_ft = out_ft.at[:, :, h - modes1:, :modes2].set(
        jnp.einsum('bixy,ioxy->boxy', x_ft[:, :, h - modes1:, :modes2], weights2))
    return jnp.fft.irfft2(out_ft, s=(h, w))


def init_spectral_weights(key, in_channels, out_channels, modes1, modes2):
    """scale * U[0,1) for real and imaginary parts (matches torch.rand cfloat init)."""
    scale = 1.0 / (in_channels * out_channels)
    shape = (in_channels, out_channels, modes1, modes2)
    k1, k2, k3, k4 = jax.random.split(key, 4)
    w1r = scale * jax.random.uniform(k1, shape, dtype=jnp.float32)
    w1i = scale * jax.random.uniform(k2, shape, dtype=jnp.float32)
    w2r = scale * jax.random.uniform(k3, shape, dtype=jnp.float32)
    w2i = scale * jax.random.uniform(k4, shape, dtype=jnp.float32)
    return w1r, w1i, w2r, w2i


if __name__ == "__main__":
    batch, in_channels, out_channels = 2, 4, 4
    height = width = 16
    modes1 = modes2 = 6

    key = jax.random.PRNGKey(0)
    kx, kw = jax.random.split(key)
    x = jax.random.normal(kx, (batch, in_channels, height, width), dtype=jnp.float32)
    w1r, w1i, w2r, w2i = init_spectral_weights(
        kw, in_channels, out_channels, modes1, modes2)

    out = spectral_conv2d(x, w1r, w1i, w2r, w2i, modes1, modes2)
    out = jax.block_until_ready(out)

    ref = spectral_conv2d_ref(x, w1r + 1j * w1i, w2r + 1j * w2i, modes1, modes2)
    assert out.shape == (batch, out_channels, height, width)
    assert jnp.allclose(out, ref, atol=1e-4, rtol=1e-4), "mismatch vs reference"

    print("KERNEL_OK")
</pallas_src>

<mosaic_0001>
module attributes {stable_mosaic.version = 11 : i64} {
  func.func @_spectral_mix_kernel(%arg0: i32, %arg1: memref<1x4x128xf32, #tpu.memory_space<vmem>>, %arg2: memref<1x4x128xf32, #tpu.memory_space<vmem>>, %arg3: memref<4x4x128xf32, #tpu.memory_space<vmem>>, %arg4: memref<4x4x128xf32, #tpu.memory_space<vmem>>, %arg5: memref<1x4x128xf32, #tpu.memory_space<vmem>>, %arg6: memref<1x4x128xf32, #tpu.memory_space<vmem>>) attributes {dimension_semantics = [#tpu.dimension_semantics<parallel>], iteration_bounds = array<i64: 2>, scalar_prefetch = 0 : i64, scratch_operands = 0 : i64, tpu.core_type = #tpu.core_type<tc>, window_params = [{transform_indices = @transform_0, window_bounds = array<i64: 1, 4, 128>}, {transform_indices = @transform_1, window_bounds = array<i64: 1, 4, 128>}, {pipeline_mode = #tpu.pipeline_mode<synchronous>, transform_indices = @transform_2, window_bounds = array<i64: 4, 4, 128>}, {pipeline_mode = #tpu.pipeline_mode<synchronous>, transform_indices = @transform_3, window_bounds = array<i64: 4, 4, 128>}, {transform_indices = @transform_4, window_bounds = array<i64: 1, 4, 128>}, {transform_indices = @transform_5, window_bounds = array<i64: 1, 4, 128>}]} {
    %cst = arith.constant 0.000000e+00 : f32
    %0 = vector.broadcast %cst : f32 to vector<4x128xf32>
    %cst_0 = arith.constant 0.000000e+00 : f32
    %1 = vector.broadcast %cst_0 : f32 to vector<4x128xf32>
    %c0 = arith.constant 0 : index
    %c0_1 = arith.constant 0 : index
    %c0_2 = arith.constant 0 : index
    %2 = vector.load %arg1[%c0, %c0_1, %c0_2] : memref<1x4x128xf32, #tpu.memory_space<vmem>>, vector<1x1x128xf32>
    %3 = vector.shape_cast %2 : vector<1x1x128xf32> to vector<1x128xf32>
    %c0_3 = arith.constant 0 : index
    %c0_4 = arith.constant 0 : index
    %c0_5 = arith.constant 0 : index
    %4 = vector.load %arg2[%c0_3, %c0_4, %c0_5] : memref<1x4x128xf32, #tpu.memory_space<vmem>>, vector<1x1x128xf32>
    %5 = vector.shape_cast %4 : vector<1x1x128xf32> to vector<1x128xf32>
    %c0_6 = arith.constant 0 : index
    %c0_7 = arith.constant 0 : index
    %c0_8 = arith.constant 0 : index
    %6 = vector.load %arg3[%c0_6, %c0_7, %c0_8] : memref<4x4x128xf32, #tpu.memory_space<vmem>>, vector<1x4x128xf32>
    %7 = vector.shape_cast %6 : vector<1x4x128xf32> to vector<4x128xf32>
    %c0_9 = arith.constant 0 : index
    %c0_10 = arith.constant 0 : index
    %c0_11 = arith.constant 0 : index
    %8 = vector.load %arg4[%c0_9, %c0_10, %c0_11] : memref<4x4x128xf32, #tpu.memory_space<vmem>>, vector<1x4x128xf32>
    %9 = vector.shape_cast %8 : vector<1x4x128xf32> to vector<4x128xf32>
    %10 = vector.broadcast %3 : vector<1x128xf32> to vector<4x128xf32>
    %11 = arith.mulf %10, %7 : vector<4x128xf32>
    %12 = arith.addf %0, %11 : vector<4x128xf32>
    %13 = vector.broadcast %5 : vector<1x128xf32> to vector<4x128xf32>
    %14 = arith.mulf %13, %9 : vector<4x128xf32>
    %15 = arith.subf %12, %14 : vector<4x128xf32>
    %16 = vector.broadcast %3 : vector<1x128xf32> to vector<4x128xf32>
    %17 = arith.mulf %16, %9 : vector<4x128xf32>
    %18 = arith.addf %1, %17 : vector<4x128xf32>
    %19 = vector.broadcast %5 : vector<1x128xf32> to vector<4x128xf32>
    %20 = arith.mulf %19, %7 : vector<4x128xf32>
    %21 = arith.addf %18, %20 : vector<4x128xf32>
    %c0_12 = arith.constant 0 : index
    %c1 = arith.constant 1 : index
    %c0_13 = arith.constant 0 : index
    %22 = vector.load %arg1[%c0_12, %c1, %c0_13] : memref<1x4x128xf32, #tpu.memory_space<vmem>>, vector<1x1x128xf32>
    %23 = vector.shape_cast %22 : vector<1x1x128xf32> to vector<1x128xf32>
    %c0_14 = arith.constant 0 : index
    %c1_15 = arith.constant 1 : index
    %c0_16 = arith.constant 0 : index
    %24 = vector.load %arg2[%c0_14, %c1_15, %c0_16] : memref<1x4x128xf32, #tpu.memory_space<vmem>>, vector<1x1x128xf32>
    %25 = vector.shape_cast %24 : vector<1x1x128xf32> to vector<1x128xf32>
    %c1_17 = arith.constant 1 : index
    %c0_18 = arith.constant 0 : index
    %c0_19 = arith.constant 0 : index
    %26 = vector.load %arg3[%c1_17, %c0_18, %c0_19] : memref<4x4x128xf32, #tpu.memory_space<vmem>>, vector<1x4x128xf32>
    %27 = vector.shape_cast %26 : vector<1x4x128xf32> to vector<4x128xf32>
    %c1_20 = arith.constant 1 : index
    %c0_21 = arith.constant 0 : index
    %c0_22 = arith.constant 0 : index
    %28 = vector.load %arg4[%c1_20, %c0_21, %c0_22] : memref<4x4x128xf32, #tpu.memory_space<vmem>>, vector<1x4x128xf32>
    %29 = vector.shape_cast %28 : vector<1x4x128xf32> to vector<4x128xf32>
    %30 = vector.broadcast %23 : vector<1x128xf32> to vector<4x128xf32>
    %31 = arith.mulf %30, %27 : vector<4x128xf32>
    %32 = arith.addf %15, %31 : vector<4x128xf32>
    %33 = vector.broadcast %25 : vector<1x128xf32> to vector<4x128xf32>
    %34 = arith.mulf %33, %29 : vector<4x128xf32>
    %35 = arith.subf %32, %34 : vector<4x128xf32>
    %36 = vector.broadcast %23 : vector<1x128xf32> to vector<4x128xf32>
    %37 = arith.mulf %36, %29 : vector<4x128xf32>
    %38 = arith.addf %21, %37 : vector<4x128xf32>
    %39 = vector.broadcast %25 : vector<1x128xf32> to vector<4x128xf32>
    %40 = arith.mulf %39, %27 : vector<4x128xf32>
    %41 = arith.addf %38, %40 : vector<4x128xf32>
    %c0_23 = arith.constant 0 : index
    %c2 = arith.constant 2 : index
    %c0_24 = arith.constant 0 : index
    %42 = vector.load %arg1[%c0_23, %c2, %c0_24] : memref<1x4x128xf32, #tpu.memory_space<vmem>>, vector<1x1x128xf32>
    %43 = vector.shape_cast %42 : vector<1x1x128xf32> to vector<1x128xf32>
    %c0_25 = arith.constant 0 : index
    %c2_26 = arith.constant 2 : index
    %c0_27 = arith.constant 0 : index
    %44 = vector.load %arg2[%c0_25, %c2_26, %c0_27] : memref<1x4x128xf32, #tpu.memory_space<vmem>>, vector<1x1x128xf32>
    %45 = vector.shape_cast %44 : vector<1x1x128xf32> to vector<1x128xf32>
    %c2_28 = arith.constant 2 : index
    %c0_29 = arith.constant 0 : index
    %c0_30 = arith.constant 0 : index
    %46 = vector.load %arg3[%c2_28, %c0_29, %c0_30] : memref<4x4x128xf32, #tpu.memory_space<vmem>>, vector<1x4x128xf32>
    %47 = vector.shape_cast %46 : vector<1x4x128xf32> to vector<4x128xf32>
    %c2_31 = arith.constant 2 : index
    %c0_32 = arith.constant 0 : index
    %c0_33 = arith.constant 0 : index
    %48 = vector.load %arg4[%c2_31, %c0_32, %c0_33] : memref<4x4x128xf32, #tpu.memory_space<vmem>>, vector<1x4x128xf32>
    %49 = vector.shape_cast %48 : vector<1x4x128xf32> to vector<4x128xf32>
    %50 = vector.broadcast %43 : vector<1x128xf32> to vector<4x128xf32>
    %51 = arith.mulf %50, %47 : vector<4x128xf32>
    %52 = arith.addf %35, %51 : vector<4x128xf32>
    %53 = vector.broadcast %45 : vector<1x128xf32> to vector<4x128xf32>
    %54 = arith.mulf %53, %49 : vector<4x128xf32>
    %55 = arith.subf %52, %54 : vector<4x128xf32>
    %56 = vector.broadcast %43 : vector<1x128xf32> to vector<4x128xf32>
    %57 = arith.mulf %56, %49 : vector<4x128xf32>
    %58 = arith.addf %41, %57 : vector<4x128xf32>
    %59 = vector.broadcast %45 : vector<1x128xf32> to vector<4x128xf32>
    %60 = arith.mulf %59, %47 : vector<4x128xf32>
    %61 = arith.addf %58, %60 : vector<4x128xf32>
    %c0_34 = arith.constant 0 : index
    %c3 = arith.constant 3 : index
    %c0_35 = arith.constant 0 : index
    %62 = vector.load %arg1[%c0_34, %c3, %c0_35] : memref<1x4x128xf32, #tpu.memory_space<vmem>>, vector<1x1x128xf32>
    %63 = vector.shape_cast %62 : vector<1x1x128xf32> to vector<1x128xf32>
    %c0_36 = arith.constant 0 : index
    %c3_37 = arith.constant 3 : index
    %c0_38 = arith.constant 0 : index
    %64 = vector.load %arg2[%c0_36, %c3_37, %c0_38] : memref<1x4x128xf32, #tpu.memory_space<vmem>>, vector<1x1x128xf32>
    %65 = vector.shape_cast %64 : vector<1x1x128xf32> to vector<1x128xf32>
    %c3_39 = arith.constant 3 : index
    %c0_40 = arith.constant 0 : index
    %c0_41 = arith.constant 0 : index
    %66 = vector.load %arg3[%c3_39, %c0_40, %c0_41] : memref<4x4x128xf32, #tpu.memory_space<vmem>>, vector<1x4x128xf32>
    %67 = vector.shape_cast %66 : vector<1x4x128xf32> to vector<4x128xf32>
    %c3_42 = arith.constant 3 : index
    %c0_43 = arith.constant 0 : index
    %c0_44 = arith.constant 0 : index
    %68 = vector.load %arg4[%c3_42, %c0_43, %c0_44] : memref<4x4x128xf32, #tpu.memory_space<vmem>>, vector<1x4x128xf32>
    %69 = vector.shape_cast %68 : vector<1x4x128xf32> to vector<4x128xf32>
    %70 = vector.broadcast %63 : vector<1x128xf32> to vector<4x128xf32>
    %71 = arith.mulf %70, %67 : vector<4x128xf32>
    %72 = arith.addf %55, %71 : vector<4x128xf32>
    %73 = vector.broadcast %65 : vector<1x128xf32> to vector<4x128xf32>
    %74 = arith.mulf %73, %69 : vector<4x128xf32>
    %75 = arith.subf %72, %74 : vector<4x128xf32>
    %76 = vector.broadcast %63 : vector<1x128xf32> to vector<4x128xf32>
    %77 = arith.mulf %76, %69 : vector<4x128xf32>
    %78 = arith.addf %61, %77 : vector<4x128xf32>
    %79 = vector.broadcast %65 : vector<1x128xf32> to vector<4x128xf32>
    %80 = arith.mulf %79, %67 : vector<4x128xf32>
    %81 = arith.addf %78, %80 : vector<4x128xf32>
    %c0_45 = arith.constant 0 : index
    %c0_46 = arith.constant 0 : index
    %c0_47 = arith.constant 0 : index
    %82 = vector.load %arg5[%c0_45, %c0_46, %c0_47] : memref<1x4x128xf32, #tpu.memory_space<vmem>>, vector<1x4x128xf32>
    %83 = vector.shape_cast %82 : vector<1x4x128xf32> to vector<4x128xf32>
    %84 = vector.shape_cast %75 : vector<4x128xf32> to vector<1x4x128xf32>
    tpu.vector_store %arg5[%c0_45, %c0_46, %c0_47], %84 {strides = array<i32>} : memref<1x4x128xf32, #tpu.memory_space<vmem>>, vector<1x4x128xf32>,
    %c0_48 = arith.constant 0 : index
    %c0_49 = arith.constant 0 : index
    %c0_50 = arith.constant 0 : index
    %85 = vector.load %arg6[%c0_48, %c0_49, %c0_50] : memref<1x4x128xf32, #tpu.memory_space<vmem>>, vector<1x4x128xf32>
    %86 = vector.shape_cast %85 : vector<1x4x128xf32> to vector<4x128xf32>
    %87 = vector.shape_cast %81 : vector<4x128xf32> to vector<1x4x128xf32>
    tpu.vector_store %arg6[%c0_48, %c0_49, %c0_50], %87 {strides = array<i32>} : memref<1x4x128xf32, #tpu.memory_space<vmem>>, vector<1x4x128xf32>,
    return
  }
  func.func @transform_0(%arg0: i32) -> (i32, i32, i32) {
    %c0_i32 = arith.constant 0 : i32
    %c0_i32_0 = arith.constant 0 : i32
    %c0_i32_1 = arith.constant 0 : i32
    return %arg0, %c0_i32, %c0_i32_0 : i32, i32, i32
  }
  func.func @transform_1(%arg0: i32) -> (i32, i32, i32) {
    %c0_i32 = arith.constant 0 : i32
    %c0_i32_0 = arith.constant 0 : i32
    %c0_i32_1 = arith.constant 0 : i32
    return %arg0, %c0_i32, %c0_i32_0 : i32, i32, i32
  }
  func.func @transform_2(%arg0: i32) -> (i32, i32, i32) {
    %c0_i32 = arith.constant 0 : i32
    %c0_i32_0 = arith.constant 0 : i32
    %c0_i32_1 = arith.constant 0 : i32
    %c0_i32_2 = arith.constant 0 : i32
    return %c0_i32, %c0_i32_0, %c0_i32_1 : i32, i32, i32
  }
  func.func @transform_3(%arg0: i32) -> (i32, i32, i32) {
    %c0_i32 = arith.constant 0 : i32
    %c0_i32_0 = arith.constant 0 : i32
    %c0_i32_1 = arith.constant 0 : i32
    %c0_i32_2 = arith.constant 0 : i32
    return %c0_i32, %c0_i32_0, %c0_i32_1 : i32, i32, i32
  }
  func.func @transform_4(%arg0: i32) -> (i32, i32, i32) {
    %c0_i32 = arith.constant 0 : i32
    %c0_i32_0 = arith.constant 0 : i32
    %c0_i32_1 = arith.constant 0 : i32
    return %arg0, %c0_i32, %c0_i32_0 : i32, i32, i32
  }
  func.func @transform_5(%arg0: i32) -> (i32, i32, i32) {
    %c0_i32 = arith.constant 0 : i32
    %c0_i32_0 = arith.constant 0 : i32
    %c0_i32_1 = arith.constant 0 : i32
    return %arg0, %c0_i32, %c0_i32_0 : i32, i32, i32
  }
}

</mosaic_0001>

<bundles_post_ra>
// kernel: tpu_custom_call.1
= control target key start
LH: loop header
LB: loop body
LE: loop exit
PB: predicated region body
PF: predicated region fallthrough
CT: control target
= control target key end

     0   :  { %s1272_s0 = inlined_call_operand.hbm [shape: f32[2,4,128], index: 0, kind: input, shape index: {}]   ;;  %s1273_s1 = inlined_call_operand.hbm [shape: f32[2,4,128], index: 1, kind: input, shape index: {}]   ;;  %s1274_s2 = inlined_call_operand.hbm [shape: f32[4,4,128], index: 2, kind: input, shape index: {}]   ;;  %s1275_s3 = inlined_call_operand.hbm [shape: f32[4,4,128], index: 3, kind: input, shape index: {}]   ;;  %s1276_s4 = inlined_call_operand.hbm [shape: f32[2,4,128], index: 4, kind: output, shape index: {0}]   ;;  %s1277_s5 = inlined_call_operand.hbm [shape: f32[2,4,128], index: 5, kind: output, shape index: {1}]  }
   0x1   :  { %1282 = sst [smem:[#allocation19_spill]] %s1274_s2 }
   0x2   :  { %1283 = sst [smem:[#allocation20_spill]] %s1275_s3 }
   0x3   :  { %11 = vsyncpa [#allocation3], 0 }
   0x4   :  { %13 = vsyncpa [#allocation3 + $0x1], 0 }
   0x5   :  { %14 = vsyncpa [#allocation6], 0 }
   0x6   :  { %16 = vsyncpa [#allocation6 + $0x1], 0 }
   0x7   :  { %17 = vsyncpa [#allocation9], 0 }
   0x8   :  { %18 = vsyncpa [#allocation4], 0 }
   0x9   :  { %20 = vsyncpa [#allocation4 + $0x1], 0 }
   0xa   :  { %21 = vsyncpa [#allocation12], 0 }
   0xb   :  { %23 = vsyncpa [#allocation12 + $0x1], 0  ;;  %s956_s18 = smov 0   ;;  %s958_s19 = smov 0  }
   0xc   :  { %s960_s20 = smov 0   ;;  %s962_s21 = smov 0  }
   0xd LB: > { %s977_s22 = sadd.s32 4294967295, %s916_s21   ;;  %s581_s23 = sadd.s32 4294967294, %s916_s21   ;;  %s916_s21 = sphi %s962_s21, %s1305_s21   ;;  %s912_s20 = sphi %s960_s20, %s1304_s20   ;;  %s908_s19 = sphi %s958_s19, %s1303_s19   ;;  %s904_s18 = sphi %s956_s18, %s1302_s18  }
   0xe   : > { %p49_p0 = scmp.ne.s32.totalorder %s908_s19, %s904_s18  ;;  %p1278_p1 = scmp.eq.s32.totalorder %s977_s22, 0 }
   0xf   : > { %p147_p3 = scmp.eq.s32.totalorder %s581_s23, 1  ;;  %p582_p5 = scmp.ge.s32.totalorder %s916_s21, 1 }
  0x10   : > { %p986_p4 = por %p1278_p1, %p49_p0  ;;  %p180_p7 = scmp.lt.s32.totalorder %s916_s21, 3 }
  0x11   : > { %p991_p6 = por %p147_p3, %p49_p0  ;;  %s918_s27 = smov [#allocation7]  }
  0x12   : > { %s1284_s24 = scalar_select %p986_p4, 1, 0 }
  0x13   : > { %s1285_s25 = scalar_select %p991_p6, 1, 0 }
  0x14   : > { %p996_p8 = pnand %p582_p5, %p180_p7  ;;  %s192_s28 = sshll.u32 %s918_s27, 4  ;;  %s1000_s28 = int_to_ptr.vmem [resolvable:$true] %s192_s28 }
  0x15   : > { %s919_s30 = smov [#allocation8]   ;;  %s1288_s2 = sld [smem:[#allocation19_spill]] }
  0x16   : > { %s1286_s26 = scalar_select %p996_p8, 1, 0 }
  0x17   : > { %p627_p9 = pneg %p996_p8  ;;  %s205_s6 = sshll.u32 %s919_s30, 4  ;;  %s1011_s6 = int_to_ptr.vmem [resolvable:$true] %s205_s6 }
  0x19   : > { %p1007_p11 = pnand %p627_p9, %p1278_p1 }
  0x1b   : > { %s690_s9 = scalar_lea.hbm %s1288_s2, 256  ;;  %p692_p13 = pneg %p1007_p11 }
  0x1c   : > { %p691_p12 = scmp.ne.s32.totalorder %s1288_s2, %s690_s9  ;;  %p697_p5 = scmp.lt.u32.totalorder %s690_s9, %s1288_s2 }
  0x1e   : > { %p693_p0 = pnand %p692_p13, %p691_p12 }
  0x20   : > { %p694_p3 = pneg %p693_p0 }
  0x22   : > { %p699_p7 = pnand %p697_p5, %p694_p3 }
  0x24   : > { %702 = shalt.err (!%p699_p7)
}
  0x25   : > { %s703_s14 = scalar_lea.vmem %s1000_s28, 256  ;;  %p711_p2 = scmp.lt.s32.totalorder %s1000_s28, %s1000_s28 }
  0x26   : > { %p704_p9 = scmp.ne.s32.totalorder %s1000_s28, %s703_s14  ;;  %p712_p12 = scmp.lt.s32.totalorder %s703_s14, %s703_s14 }
  0x28   : > { %p706_p10 = pnand %p704_p9, %p692_p13  ;;  %p713_p0 = por %p712_p12, %p711_p2 }
  0x2a   : > { %p707_p1 = pneg %p706_p10 }
  0x2c   : > { %p714_p6 = pnand %p713_p0, %p707_p1 }
  0x2e   : > { %717 = shalt.err (!%p714_p6)
}
  0x2f   : > { %s920_s15 = smov 64   ;;  %s921_s16 = smov 4  }
  0x30   : > { %630 = dma.hbm_to_vmem [thread:$0]  (!%p1007_p11), %s1288_s2, 256, %s1000_s28, [#allocation6], %s920_s15, %s920_s15, %s921_s16  }
  0x31   : > { %s1289_s3 = sld [smem:[#allocation20_spill]] }
  0x37   : > { %s718_s7 = scalar_lea.hbm %s1289_s3, 256 }
  0x38   : > { %p719_p2 = scmp.ne.s32.totalorder %s1289_s3, %s718_s7  ;;  %p725_p10 = scmp.lt.u32.totalorder %s718_s7, %s1289_s3 }
  0x3a   : > { %p721_p1 = pnand %p719_p2, %p692_p13 }
  0x3c   : > { %p722_p6 = pneg %p721_p1 }
  0x3e   : > { %p727_p3 = pnand %p725_p10, %p722_p6 }
  0x40   : > { %730 = shalt.err (!%p727_p3)
}
  0x41   : > { %s731_s28 = scalar_lea.vmem %s1011_s6, 256  ;;  %p739_p12 = scmp.lt.s32.totalorder %s1011_s6, %s1011_s6 }
  0x42   : > { %p732_p5 = scmp.ne.s32.totalorder %s1011_s6, %s731_s28  ;;  %p740_p0 = scmp.lt.s32.totalorder %s731_s28, %s731_s28 }
  0x44   : > { %p734_p7 = pnand %p732_p5, %p692_p13  ;;  %p741_p2 = por %p740_p0, %p739_p12 }
  0x46   : > { %p735_p9 = pneg %p734_p7 }
  0x48   : > { %p742_p1 = pnand %p741_p2, %p735_p9 }
  0x4a   : > { %745 = shalt.err (!%p742_p1)
}
  0x4b   : > { %633 = dma.hbm_to_vmem [thread:$0]  (!%p1007_p11), %s1289_s3, 256, %s1011_s6, [#allocation9], %s920_s15, %s920_s15, %s921_s16  }
  0x4c   : > { %s1066_s14 = sadd.s32 1, %s916_s21   ;;  %s36_s29 = sadd.s32 1, %s912_s20 }
  0x4d   : > { %s33_s17 = ssub.s32 %s916_s21, %s1066_s14  ;;  %p43_p13 = scmp.ne.s32.totalorder %s912_s20, %s908_s19 }
  0x4e   : > { %p34_p6 = scmp.eq.s32.totalorder %s33_s17, 0  ;;  %p44_p10 = scmp.eq.s32.totalorder %s916_s21, 0 }
  0x4f   : > { %p1290_p3 = scmp.eq.s32.totalorder %s977_s22, 1  ;;  %p650_p7 = scmp.lt.s32.totalorder %s916_s21, 2 }
  0x50   : > { %s1082_s27 = scalar_select %p34_p6, %s912_s20, %s36_s29  }
  0x51   : > { %p1076_p5 = por %p1290_p3, %p43_p13  ;;  %p45_p9 = por %p44_p10, %p43_p13 }
  0x52   : > { %s219_s30 = sand.u32 1, %s912_s20   ;;  %s587_s15 = sshll.u32 %s916_s21, 6 }
  0x53   : > { %s1291_s23 = scalar_select %p1076_p5, 1, 0 }
  0x54   : > { %s1085_s6 = sshll.u32 %s219_s30, 2  ;;  %s1091_s8 = scalar_lea.hbm %s1272_s0, %s587_s15 }
  0x55   : > { %s223_s9 = scalar_lea.vmem [#allocation2], %s1085_s6  ;;  %p1096_p11 = pnand %p650_p7, %p45_p9 }
  0x56   : > { %s230_s10 = sshll.u32 %s223_s9, 4  ;;  %s1103_s13 = scalar_lea.hbm %s1273_s1, %s587_s15  ;;  %s1094_s10 = int_to_ptr.vmem [resolvable:$true] %s230_s10 }
  0x57   : > { %s237_s29 = sand.u32 1, %s916_s21   ;;  %s220_s17 = scalar_lea.sflag [#allocation3], %s219_s30 }
  0x58   : > { %s746_s16 = scalar_lea.hbm %s1091_s8, 64  ;;  %p748_p0 = pneg %p1096_p11 }
  0x59   : > { %p747_p12 = scmp.ne.s32.totalorder %s1091_s8, %s746_s16  ;;  %s751_s2 = scalar_lea.hbm %s1272_s0, 128 }
  0x5a   : > { %p752_p13 = scmp.lt.u32.totalorder %s1091_s8, %s1272_s0  ;;  %p753_p6 = scmp.lt.u32.totalorder %s751_s2, %s746_s16 }
  0x5b   : > { %p749_p2 = pnand %p748_p0, %p747_p12  ;;  %p755_p3 = scmp.lt.u32.totalorder %s746_s16, %s1091_s8 }
  0x5c   : > { %p754_p10 = por %p753_p6, %p752_p13 }
  0x5d   : > { %p750_p1 = pneg %p749_p2 }
  0x5e   : > { %p756_p7 = por %p755_p3, %p754_p10 }
  0x60   : > { %p757_p9 = pnand %p756_p7, %p750_p1 }
  0x62   : > { %760 = shalt.err (!%p757_p9)
}
  0x63   : > { %s761_s30 = scalar_lea.vmem %s1094_s10, 64  ;;  %s922_s15 = smov [#allocation2]  }
  0x64   : > { %p762_p12 = scmp.ne.s32.totalorder %s1094_s10, %s761_s30  ;;  %s766_s12 = sshll.u32 %s922_s15, 4  ;;  %s767_s12 = int_to_ptr.vmem [resolvable:$false] %s766_s12 }
  0x65   : > { %s768_s3 = scalar_lea.vmem %s767_s12, 128  ;;  %p769_p4 = scmp.lt.s32.totalorder %s1094_s10, %s767_s12 }
  0x66   : > { %p764_p2 = pnand %p762_p12, %p748_p0  ;;  %p770_p13 = scmp.lt.s32.totalorder %s768_s3, %s761_s30 }
  0x68   : > { %p765_p5 = pneg %p764_p2  ;;  %p771_p6 = por %p770_p13, %p769_p4 }
  0x6a   : > { %p772_p10 = pnand %p771_p6, %p765_p5 }
  0x6c   : > { %775 = shalt.err (!%p772_p10)
}
  0x6d   : > { %637 = dma.hbm_to_vmem [thread:$0]  (!%p1096_p11), %s1091_s8, 64, %s1094_s10, %s220_s17  }
  0x6e   : > { %s241_s2 = scalar_lea.vmem [#allocation5], %s1085_s6  ;;  %s238_s7 = scalar_lea.sflag [#allocation6], %s237_s29 }
  0x6f   : > { %s248_s16 = sshll.u32 %s241_s2, 4  ;;  %s776_s9 = scalar_lea.hbm %s1103_s13, 64  ;;  %s249_s16 = int_to_ptr.vmem [resolvable:$true] %s248_s16 }
  0x70   : > { %p777_p4 = scmp.ne.s32.totalorder %s1103_s13, %s776_s9  ;;  %s781_s15 = scalar_lea.hbm %s1273_s1, 128 }
  0x71   : > { %p782_p3 = scmp.lt.u32.totalorder %s1103_s13, %s1273_s1  ;;  %p783_p7 = scmp.lt.u32.totalorder %s781_s15, %s776_s9 }
  0x72   : > { %p779_p5 = pnand %p777_p4, %p748_p0  ;;  %p785_p12 = scmp.lt.u32.totalorder %s776_s9, %s1103_s13 }
  0x73   : > { %p784_p9 = por %p783_p7, %p782_p3 }
  0x74   : > { %p780_p1 = pneg %p779_p5 }
  0x75   : > { %p786_p2 = por %p785_p12, %p784_p9 }
  0x77   : > { %p787_p13 = pnand %p786_p2, %p780_p1 }
  0x79   : > { %790 = shalt.err (!%p787_p13)
}
  0x7a   : > { %s791_s6 = scalar_lea.vmem %s249_s16, 64  ;;  %s923_s8 = smov [#allocation5]  }
  0x7b   : > { %p792_p6 = scmp.ne.s32.totalorder %s249_s16, %s791_s6  ;;  %s796_s10 = sshll.u32 %s923_s8, 4  ;;  %s797_s10 = int_to_ptr.vmem [resolvable:$false] %s796_s10 }
  0x7c   : > { %s798_s29 = scalar_lea.vmem %s797_s10, 128  ;;  %p799_p5 = scmp.lt.s32.totalorder %s249_s16, %s797_s10 }
  0x7d   : > { %p794_p10 = pnand %p792_p6, %p748_p0  ;;  %p800_p8 = scmp.lt.s32.totalorder %s798_s29, %s791_s6 }
  0x7f   : > { %p795_p4 = pneg %p794_p10  ;;  %p801_p3 = por %p800_p8, %p799_p5 }
  0x81   : > { %p802_p7 = pnand %p801_p3, %p795_p4 }
  0x83   : > { %805 = shalt.err (!%p802_p7)
}
  0x84   : > { %640 = dma.hbm_to_vmem [thread:$0]  (!%p1096_p11), %s1103_s13, 64, %s249_s16, %s238_s7  }
  0x85   : > { %p1293_p1 = scmp.ne.s32.totalorder %s1286_s26, 0 }
  0x86   : > { %s1156_s17 = sand.u32 (!%p1293_p1), 1, %s908_s19   ;;  %p1294_p8 = scmp.ne.s32.totalorder (!%p1293_p1), %s1284_s24, 0 }
  0x87   : > { %257 = sbr.rel (%p1293_p1) target bundleno = 208 (0xd0), region = 36  ;;  %s1159_s2 = sshll.u32 (!%p1293_p1), %s1156_s17, 2 }
  0x88   : > { %s260_s9 = scalar_lea.sflag (!%p1293_p1), [#allocation3], %s1156_s17  ;;  %s1163_s28 = scalar_lea.vmem (!%p1293_p1), [#allocation2], %s1159_s2 }
  0x8e   : > { %879 = dma.done.wait (%p1294_p8), %s260_s9, 64  }
  0x8f   : > { %881 = vsyncadd (%p1294_p8), %s260_s9, 4294967232  ;;  %s268_s26 = sand.u32 1, %s977_s22   ;;  %s1171_s13 = scalar_lea.vmem [#allocation5], %s1159_s2 }
  0x90   : > { %s269_s11 = scalar_lea.sflag [#allocation6], %s268_s26 }
  0x91   : > { %883 = dma.done.wait (%p1294_p8), %s269_s11, 64  }
  0x92   : > { %885 = vsyncadd (%p1294_p8), %s269_s11, 4294967232  ;;  %p1295_p11 = scmp.eq.s32.totalorder %s977_s22, 0 }
  0x94   : > { %887 = dma.done.wait (%p1295_p11), [#allocation6], 256   ;;  %p1296_p0 = pmov %p1295_p11 }
  0x96   : > { %889 = vsyncadd (%p1296_p0), [#allocation6], 4294967040  ;;  %p1297_p9 = pmov %p1296_p0 }
  0x97   : > { %p1298_p12 = pmov %p1296_p0 }
  0x98   : > { %891 = dma.done.wait (%p1297_p9), [#allocation9], 256  }
  0x99   : > { %893 = vsyncadd (%p1298_p12), [#allocation9], 4294967040  ;;  %v597_v0 = vld [vmem:[%s1163_s28] ss:$0 sm:$0xff]  ;;  %v598_v1 = vld [vmem:[%s1171_s13] ss:$0 sm:$0xff] }
  0x9a   : > { %v319_v2 = vld [vmem:[#allocation7] sm:$0xf]  ;;  %v320_v3 = vld [vmem:[#allocation8] sm:$0xf]  ;;  %v600_v6 = vld [vmem:[%s1171_s13 + $0x1] ss:$0 sm:$0xff] }
  0x9b   : > { %v325_v4 = vmul.f32 %v597_v0, %v319_v2  ;;  %v599_v5 = vld [vmem:[%s1163_s28 + $0x1] ss:$0 sm:$0xff]  ;;  %v335_v7 = vmul.f32 %v598_v1, %v319_v2  ;;  %v331_v8 = vmul.f32 %v598_v1, %v320_v3  ;;  %v340_v9 = vld [vmem:[#allocation7 + $0x4] sm:$0xf]  ;;  %v333_v11 = vmul.f32 %v597_v0, %v320_v3  ;;  %v601_v13 = vld [vmem:[%s1163_s28 + $0x2] ss:$0 sm:$0xff] }
  0x9c   : > { %v342_v10 = vld [vmem:[#allocation8 + $0x4] sm:$0xf]  ;;  %v347_v12 = vmul.f32 %v599_v5, %v340_v9  ;;  %v362_v14 = vld [vmem:[#allocation7 + $0x8] sm:$0xf]  ;;  %v364_v15 = vld [vmem:[#allocation8 + $0x8] sm:$0xf]  ;;  %v357_v20 = vmul.f32 %v600_v6, %v340_v9 }
  0x9d   : > { %v355_v16 = vmul.f32 %v599_v5, %v342_v10  ;;  %v332_v17 = vsub.f32 %v325_v4, %v331_v8  ;;  %v353_v18 = vmul.f32 %v600_v6, %v342_v10  ;;  %v336_v19 = vadd.f32 %v335_v7, %v333_v11  ;;  %v602_v21 = vld [vmem:[%s1171_s13 + $0x2] ss:$0 sm:$0xff]  ;;  %v603_v26 = vld [vmem:[%s1163_s28 + $0x3] ss:$0 sm:$0xff]  ;;  %v384_v27 = vld [vmem:[#allocation7 + $0xc] sm:$0xf] }
  0x9e   : > { %v369_v23 = vmul.f32 %v601_v13, %v362_v14  ;;  %v377_v25 = vmul.f32 %v601_v13, %v364_v15  ;;  %v386_v28 = vld [vmem:[#allocation8 + $0xc] sm:$0xf]  ;;  %v375_v30 = vmul.f32 %v602_v21, %v364_v15  ;;  %v379_v32 = vmul.f32 %v602_v21, %v362_v14  ;;  %s309_s24 = scalar_lea.vmem [#allocation10], %s1159_s2  ;;  %s316_s7 = scalar_lea.vmem [#allocation11], %s1159_s2 }
  0x9f   : > { %v348_v22 = vadd.f32 %v347_v12, %v332_v17  ;;  %v356_v24 = vadd.f32 %v355_v16, %v336_v19  ;;  %v604_v33 = vld [vmem:[%s1171_s13 + $0x3] ss:$0 sm:$0xff]  ;;  %v391_v35 = vmul.f32 %v603_v26, %v384_v27  ;;  %v399_v37 = vmul.f32 %v603_v26, %v386_v28  ;;  %s424_s16 = sshll.u32 %s309_s24, 4  ;;  %s437_s30 = sshll.u32 %s316_s7, 4  ;;  %s1196_s16 = int_to_ptr.vmem [resolvable:$true] %s424_s16  ;;  %s1198_s30 = int_to_ptr.vmem [resolvable:$true] %s437_s30 }
  0xa0   : > { %v397_v39 = vmul.f32 %v604_v33, %v386_v28  ;;  %v401_v41 = vmul.f32 %v604_v33, %v384_v27  ;;  %s607_s15 = sshll.u32 %s977_s22, 6  ;;  %s406_s29 = scalar_lea.sflag [#allocation4], %s1156_s17 }
  0xa1   : > { %v354_v29 = vsub.f32 %v348_v22, %v353_v18  ;;  %v358_v31 = vadd.f32 %v357_v20, %v356_v24  ;;  %s1203_s6 = scalar_lea.hbm %s1276_s4, %s607_s15  ;;  %s1208_s22 = scalar_lea.hbm %s1277_s5, %s607_s15 }
  0xa2   : > { %s806_s2 = scalar_lea.vmem %s1196_s16, 64  ;;  %p1299_p13 = scmp.ne.s32.totalorder %s1291_s23, 0 }
  0xa3   : > { %v370_v34 = vadd.f32 %v369_v23, %v354_v29  ;;  %v378_v36 = vadd.f32 %v377_v25, %v358_v31  ;;  %p807_p2 = scmp.ne.s32.totalorder %s1196_s16, %s806_s2  ;;  %s924_s9 = smov [#allocation10]  }
  0xa4   : > { %s810_s28 = sshll.u32 %s924_s9, 4  ;;  %s811_s28 = int_to_ptr.vmem [resolvable:$false] %s810_s28 }
  0xa5   : > { %v376_v38 = vsub.f32 %v370_v34, %v375_v30  ;;  %v380_v40 = vadd.f32 %v379_v32, %v378_v36  ;;  %p808_p6 = pnand %p807_p2, %p1299_p13  ;;  %s812_s26 = scalar_lea.vmem %s811_s28, 128 }
  0xa6   : > { %p813_p4 = scmp.lt.s32.totalorder %s1196_s16, %s811_s28  ;;  %p814_p5 = scmp.lt.s32.totalorder %s812_s26, %s806_s2 }
  0xa7   : > { %v392_v42 = vadd.f32 %v391_v35, %v376_v38  ;;  %v400_v43 = vadd.f32 %v399_v37, %v380_v40  ;;  %p809_p10 = pneg %p808_p6 }
  0xa8   : > { %p815_p3 = por %p814_p5, %p813_p4 }
  0xa9   : > { %v398_v44 = vsub.f32 %v392_v42, %v397_v39  ;;  %v402_v45 = vadd.f32 %v401_v41, %v400_v43 }
  0xaa   : > { %p816_p7 = pnand %p815_p3, %p809_p10 }
  0xab   : > { %403 = vst [vmem:[%s309_s24] sm:$0xf] %v398_v44  ;;  %404 = vst [vmem:[%s316_s7] sm:$0xf] %v402_v45 }
  0xac   : > { %819 = shalt.err (!%p816_p7)
}
  0xad   : > { %s820_s11 = scalar_lea.hbm %s1203_s6, 64  ;;  %s824_s7 = scalar_lea.hbm %s1276_s4, 128 }
  0xae   : > { %p821_p1 = scmp.ne.s32.totalorder %s1203_s6, %s820_s11  ;;  %p825_p0 = scmp.lt.u32.totalorder %s1203_s6, %s1276_s4 }
  0xaf   : > { %p826_p9 = scmp.lt.u32.totalorder %s824_s7, %s820_s11  ;;  %p828_p2 = scmp.lt.u32.totalorder %s820_s11, %s1203_s6 }
  0xb0   : > { %p822_p8 = pnand %p821_p1, %p1299_p13 }
  0xb1   : > { %p827_p12 = por %p826_p9, %p825_p0 }
  0xb2   : > { %p823_p11 = pneg %p822_p8 }
  0xb3   : > { %p829_p6 = por %p828_p2, %p827_p12 }
  0xb5   : > { %p830_p10 = pnand %p829_p6, %p823_p11 }
  0xb7   : > { %833 = shalt.err (!%p830_p10)
}
  0xb8   : > { %623 = dma.vmem_to_hbm [thread:$0]  (%p1299_p13), %s1196_s16, 64, %s1203_s6, %s406_s29  }
  0xb9   : > { %s411_s3 = scalar_lea.sflag [#allocation12], %s1156_s17  ;;  %s834_s8 = scalar_lea.vmem %s1198_s30, 64 }
  0xba   : > { %p835_p4 = scmp.ne.s32.totalorder %s1198_s30, %s834_s8  ;;  %s925_s10 = smov [#allocation11]  }
  0xbb   : > { %s838_s2 = sshll.u32 %s925_s10, 4  ;;  %s839_s2 = int_to_ptr.vmem [resolvable:$false] %s838_s2 }
  0xbc   : > { %p836_p5 = pnand %p835_p4, %p1299_p13  ;;  %s840_s9 = scalar_lea.vmem %s839_s2, 128 }
  0xbd   : > { %p841_p7 = scmp.lt.s32.totalorder %s1198_s30, %s839_s2  ;;  %p842_p1 = scmp.lt.s32.totalorder %s840_s9, %s834_s8 }
  0xbe   : > { %p837_p3 = pneg %p836_p5 }
  0xbf   : > { %p843_p8 = por %p842_p1, %p841_p7 }
  0xc1   : > { %p844_p11 = pnand %p843_p8, %p837_p3 }
  0xc3   : > { %847 = shalt.err (!%p844_p11)
}
  0xc4   : > { %s848_s17 = scalar_lea.hbm %s1208_s22, 64  ;;  %s852_s29 = scalar_lea.hbm %s1277_s5, 128 }
  0xc5   : > { %p849_p0 = scmp.ne.s32.totalorder %s1208_s22, %s848_s17  ;;  %p853_p2 = scmp.lt.u32.totalorder %s1208_s22, %s1277_s5 }
  0xc6   : > { %p854_p6 = scmp.lt.u32.totalorder %s852_s29, %s848_s17  ;;  %p856_p4 = scmp.lt.u32.totalorder %s848_s17, %s1208_s22 }
  0xc7   : > { %p850_p9 = pnand %p849_p0, %p1299_p13 }
  0xc8   : > { %p855_p10 = por %p854_p6, %p853_p2 }
  0xc9   : > { %p851_p12 = pneg %p850_p9 }
  0xca   : > { %p857_p5 = por %p856_p4, %p855_p10 }
  0xcc   : > { %p858_p3 = pnand %p857_p5, %p851_p12 }
  0xce   : > { %861 = shalt.err (!%p858_p3)
}
  0xcf   : > { %624 = dma.vmem_to_hbm [thread:$0]  (%p1299_p13), %s1198_s30, 64, %s1208_s22, %s411_s3  }
  0xd0 PF: > { %s449_s11 = sand.u32 1, %s904_s18   ;;  %p1300_p7 = scmp.ne.s32.totalorder %s1285_s25, 0 }
  0xd1   : > { %p1301_p1 = scmp.ge.s32.totalorder %s916_s21, 2  ;;  %s450_s13 = scalar_lea.sflag [#allocation4], %s449_s11 }
  0xd3   : > { %p642_p8 = pnand %p1301_p1, %p1300_p7 }
  0xd5   : > { %895 = dma.done.wait (!%p642_p8), %s450_s13, 64  }
  0xd6   : > { %897 = vsyncadd (!%p642_p8), %s450_s13, 4294967232  ;;  %s459_s24 = scalar_lea.sflag [#allocation12], %s449_s11 }
  0xd7   : > { %899 = dma.done.wait (!%p642_p8), %s459_s24, 64  }
  0xd8   : > { %901 = vsyncadd (!%p642_p8), %s459_s24, 4294967232  ;;  %p26_p13 = scmp.ge.s32.totalorder %s1066_s14, 4   ;;  %s1302_s18 = smov %s908_s19 }
  0xd9   : > { %s1303_s19 = smov %s912_s20  ;;  %s1304_s20 = smov %s1082_s27 }
  0xda   : > { %s1305_s21 = smov %s1066_s14  ;;  %28 = sbr.rel (!%p26_p13) target bundleno = 13 (0xd), region = 125 }
  0xe1   :  { %464 = vsyncpa [#allocation3], 1 }
  0xe2   :  { %466 = vsyncpa [#allocation3 + $0x1], 1 }
  0xe3   :  { %467 = vsyncpa [#allocation6], 1 }
  0xe4   :  { %469 = vsyncpa [#allocation6 + $0x1], 1 }
  0xe5   :  { %470 = vsyncpa [#allocation9], 1 }
  0xe6   :  { %471 = vsyncpa [#allocation4], 1 }
  0xe7   :  { %473 = vsyncpa [#allocation4 + $0x1], 1 }
  0xe8   :  { %474 = vsyncpa [#allocation12], 1 }
  0xe9   :  { %476 = vsyncpa [#allocation12 + $0x1], 1 }

</bundles_post_ra>
